<compile_context>
chip_gen: v7x
topology: tpu7x:2x2x1
jax: 0.10.0
libtpu: 0.0.40
codegen_flags: <defaults>
</compile_context>

<pallas_src>
import functools

import jax
import jax.numpy as jnp
from jax.experimental import pallas as pl
from jax.experimental.pallas import tpu as pltpu


def _gate_add_norm_kernel(x_ref, skip_ref, wa_ref, wb_ref, p_ref, o_ref, *,
                          eps, true_h):
    # x:     [TN, D_in]        skip: [TN, Hp]
    # wa/wb: [D_in, Hp]        p:    [4, Hp]  rows = (b_a, b_b, gamma, beta)
    x = x_ref[...]  # native dtype -> bf16 MXU path if inputs are bf16

    b_a = p_ref[0:1, :].astype(jnp.float32)
    b_b = p_ref[1:2, :].astype(jnp.float32)
    gamma = p_ref[2:3, :].astype(jnp.float32)
    beta = p_ref[3:4, :].astype(jnp.float32)

    # --- GatedLinearUnit: two lane-dense Hp-wide dots (pre-split fc) ---
    a = jnp.dot(x, wa_ref[...], preferred_element_type=jnp.float32) + b_a
    g = jnp.dot(x, wb_ref[...], preferred_element_type=jnp.float32) + b_b
    # sigmoid(g) == 0.5*tanh(0.5*g) + 0.5  -> single EUP push per element
    glu = a * (0.5 * jnp.tanh(0.5 * g) + 0.5)

    # --- AddNorm (trainable_add=False, skip_size == hidden_size) ---
    y = glu + skip_ref[...].astype(jnp.float32)

    # Single-pass LayerNorm stats. Padded feature lanes of y are exactly zero
    # (zero W columns / bias / skip pad), so they contribute nothing to the
    # sums; divide by the true feature width.
    inv_h = jnp.float32(1.0 / true_h)
    s1 = jnp.sum(y, axis=-1, keepdims=True)
    s2 = jnp.sum(y * y, axis=-1, keepdims=True)
    mean = s1 * inv_h
    var = jnp.maximum(s2 * inv_h - mean * mean, 0.0)
    out = (y - mean) * jax.lax.rsqrt(var + eps) * gamma + beta

    o_ref[...] = out.astype(o_ref.dtype)


def _round_up(v, m):
    return -(-v // m) * m


def gate_add_norm(x, skip, w, b, gamma, beta, *, eps=1e-5, row_tile=None,
                  matmul_dtype=None):
    """Fused GateAddNorm forward.

    x: [B, T, D_in], skip: [B, T, H], w: [D_in, 2H] ([in, out] layout),
    b: [2H], gamma/beta: [H].  Returns [B, T, H].
    """
    B, T, D_in = x.shape
    H = skip.shape[-1]
    assert w.shape == (D_in, 2 * H)
    # TODO(synk): skip_size != hidden_size (TimeDistributedInterpolation
    # resample), trainable_add gate and dropout are not implemented (these are
    # off in the default GateAddNorm config).

    N = B * T
    out_dtype = x.dtype

    if matmul_dtype is not None:
        # Precision tradeoff: halves HBM traffic of the dominant streams.
        x = x.astype(matmul_dtype)
        w = w.astype(matmul_dtype)

    x2 = x.reshape(N, D_in)
    skip2 = skip.reshape(N, H)

    # --- pad the feature axis to a lane-dense multiple of 128 (zero columns) ---
    Hp = _round_up(H, 128)
    w_a = w[:, :H]
    w_b = w[:, H:]
    if Hp != H:
        w_a = jnp.pad(w_a, ((0, 0), (0, Hp - H)))
        w_b = jnp.pad(w_b, ((0, 0), (0, Hp - H)))
        skip2 = jnp.pad(skip2, ((0, 0), (0, Hp - H)))

    # Merge the four per-feature vectors into one resident (4, Hp) f32 block.
    params = jnp.zeros((4, Hp), jnp.float32)
    params = (params.at[0, :H].set(b[:H].astype(jnp.float32))
                    .at[1, :H].set(b[H:].astype(jnp.float32))
                    .at[2, :H].set(gamma.astype(jnp.float32))
                    .at[3, :H].set(beta.astype(jnp.float32)))

    # --- hardware-aware sizing ---
    try:
        vmem_cap = int(pltpu.get_tpu_info().vmem_capacity_bytes)
    except Exception:
        vmem_cap = 64 * 1024 * 1024  # conservative (v7x per-TC)
    if row_tile is None:
        row_tile = 1024 if vmem_cap >= 100 * 1024 * 1024 else 512

    in_it = jnp.dtype(x2.dtype).itemsize
    sk_it = jnp.dtype(skip2.dtype).itemsize
    w_it = jnp.dtype(w_a.dtype).itemsize
    out_it = jnp.dtype(out_dtype).itemsize

    def _footprint(tn):
        return (2 * tn * D_in * in_it        # x blocks (double-buffered)
                + 2 * tn * Hp * sk_it        # skip blocks
                + 2 * tn * Hp * out_it       # out blocks
                + 2 * D_in * Hp * w_it       # W_a + W_b (single-buffered)
                + 8 * Hp * 4                 # merged param block
                + 6 * tn * Hp * 4)           # f32 intermediates

    # Row tiling WITHOUT host-side row padding: boundary block is masked.
    TN = min(int(row_tile), N)
    if TN < N:
        TN = max(8, (TN // 8) * 8)
    while TN > 8 and _footprint(TN) > int(vmem_cap * 0.6):
        TN = max(8, ((TN // 2) // 8) * 8)
    if TN < N:
        nb = -(-N // TN)
        if nb > 1 and nb % 2 == 1:
            # Prefer an even block count (parallel axis shards over 2 TCs on v7x).
            tn2 = max(8, _round_up(-(-N // (nb + 1)), 8))
            if -(-N // tn2) % 2 == 0 and _footprint(tn2) <= int(vmem_cap * 0.6):
                TN = tn2
    num_blocks = -(-N // TN)

    vmem_limit = int(min(max(32 * 1024 * 1024,
                             int(_footprint(TN) * 1.3) + (4 << 20)),
                         int(vmem_cap * 0.9)))

    # TODO(synk): for very large D_in*Hp (f32 2048x2048+) add a K-reduction grid
    # axis with a VMEM accumulator so the weight halves need not be fully
    # VMEM-resident on v7x.

    kernel = functools.partial(_gate_add_norm_kernel, eps=float(eps),
                               true_h=float(H))

    cost = pl.CostEstimate(
        flops=4 * N * D_in * Hp + 10 * N * Hp,
        transcendentals=N * Hp + N,
        bytes_accessed=(N * D_in * in_it + N * Hp * sk_it + N * Hp * out_it
                        + 2 * D_in * Hp * w_it + 4 * Hp * 4),
    )

    def _call(single_buffer_resident):
        res_kw = ({"pipeline_mode": pl.Buffered(1)}
                  if single_buffer_resident else {})
        row_spec_x = pl.BlockSpec((TN, D_in), lambda i: (i, 0))
        row_spec_h = pl.BlockSpec((TN, Hp), lambda i: (i, 0))
        resident_w = pl.BlockSpec((D_in, Hp), lambda i: (0, 0), **res_kw)
        resident_p = pl.BlockSpec((4, Hp), lambda i: (0, 0), **res_kw)
        return pl.pallas_call(
            kernel,
            out_shape=jax.ShapeDtypeStruct((N, Hp), out_dtype),
            grid=(num_blocks,),
            in_specs=[
                row_spec_x,    # x
                row_spec_h,    # skip (feature-padded)
                resident_w,    # W_a
                resident_w,    # W_b
                resident_p,    # (b_a, b_b, gamma, beta)
            ],
            out_specs=row_spec_h,
            compiler_params=pltpu.CompilerParams(
                dimension_semantics=("parallel",),
                vmem_limit_bytes=vmem_limit,
            ),
            cost_estimate=cost,
        )(x2, skip2, w_a, w_b, params)

    try:
        out2 = _call(True)      # single-buffer the resident weights/params
    except Exception:
        out2 = _call(False)     # fallback if pipeline_mode is unsupported

    if Hp != H:
        out2 = out2[:, :H]
    return out2.reshape(B, T, H)


def _xavier_uniform(key, shape, dtype=jnp.float32):
    # matches torch.nn.init.xavier_uniform_ for a 2D weight [fan_out, fan_in]
    fan_out, fan_in = shape
    limit = jnp.sqrt(6.0 / (fan_in + fan_out))
    return jax.random.uniform(key, shape, dtype, minval=-limit, maxval=limit)


if __name__ == "__main__":
    # small shapes: batch=2, seq=8, input_size=hidden_size=skip_size=32
    B, T, D_IN = 2, 8, 32
    H = D_IN  # default hidden_size = input_size; skip_size = hidden_size

    key = jax.random.PRNGKey(0)
    kx, kskip, kw = jax.random.split(key, 3)

    x = jax.random.normal(kx, (B, T, D_IN), jnp.float32)
    skip = jax.random.normal(kskip, (B, T, H), jnp.float32)

    # GatedLinearUnit.fc : Linear(D_IN -> 2H), xavier-uniform weight, zero bias
    w_torch_layout = _xavier_uniform(kw, (2 * H, D_IN))   # [out, in] like torch
    w = w_torch_layout.T                                   # kernel uses [in, out]
    b = jnp.zeros((2 * H,), jnp.float32)

    # LayerNorm affine params (torch default init: weight=1, bias=0)
    gamma = jnp.ones((H,), jnp.float32)
    beta = jnp.zeros((H,), jnp.float32)

    out = gate_add_norm(x, skip, w, b, gamma, beta)
    out = jax.block_until_ready(out)

    # quick sanity check against a pure-JAX reference
    h_ref = jnp.einsum("btd,dk->btk", x, w) + b
    glu_ref = h_ref[..., :H] * jax.nn.sigmoid(h_ref[..., H:])
    y_ref = glu_ref + skip
    mu = jnp.mean(y_ref, axis=-1, keepdims=True)
    var = jnp.mean((y_ref - mu) ** 2, axis=-1, keepdims=True)
    ref = (y_ref - mu) / jnp.sqrt(var + 1e-5) * gamma + beta
    assert out.shape == ref.shape
    assert jnp.allclose(out, ref, atol=1e-4, rtol=1e-4), "mismatch vs reference"

    print("KERNEL_OK")
</pallas_src>

<mosaic_0001>
module attributes {stable_mosaic.version = 11 : i64} {
  func.func @_gate_add_norm_kernel(%arg0: i32, %arg1: memref<16x32xf32, #tpu.memory_space<vmem>>, %arg2: memref<16x128xf32, #tpu.memory_space<vmem>>, %arg3: memref<32x128xf32, #tpu.memory_space<vmem>>, %arg4: memref<32x128xf32, #tpu.memory_space<vmem>>, %arg5: memref<4x128xf32, #tpu.memory_space<vmem>>, %arg6: memref<16x128xf32, #tpu.memory_space<vmem>>) attributes {dimension_semantics = [#tpu.dimension_semantics<parallel>], iteration_bounds = array<i64: 1>, scalar_prefetch = 0 : i64, scratch_operands = 0 : i64, tpu.core_type = #tpu.core_type<tc>, window_params = [{transform_indices = @transform_0, window_bounds = array<i64: 16, 32>}, {transform_indices = @transform_1, window_bounds = array<i64: 16, 128>}, {pipeline_mode = #tpu.pipeline_mode<synchronous>, transform_indices = @transform_2, window_bounds = array<i64: 32, 128>}, {pipeline_mode = #tpu.pipeline_mode<synchronous>, transform_indices = @transform_3, window_bounds = array<i64: 32, 128>}, {pipeline_mode = #tpu.pipeline_mode<synchronous>, transform_indices = @transform_4, window_bounds = array<i64: 4, 128>}, {transform_indices = @transform_5, window_bounds = array<i64: 16, 128>}]} {
    %c0 = arith.constant 0 : index
    %c0_0 = arith.constant 0 : index
    %0 = vector.load %arg1[%c0, %c0_0] : memref<16x32xf32, #tpu.memory_space<vmem>>, vector<16x32xf32>
    %c0_1 = arith.constant 0 : index
    %c0_2 = arith.constant 0 : index
    %1 = vector.load %arg5[%c0_1, %c0_2] : memref<4x128xf32, #tpu.memory_space<vmem>>, vector<1x128xf32>
    %c1 = arith.constant 1 : index
    %c0_3 = arith.constant 0 : index
    %2 = vector.load %arg5[%c1, %c0_3] : memref<4x128xf32, #tpu.memory_space<vmem>>, vector<1x128xf32>
    %c2 = arith.constant 2 : index
    %c0_4 = arith.constant 0 : index
    %3 = vector.load %arg5[%c2, %c0_4] : memref<4x128xf32, #tpu.memory_space<vmem>>, vector<1x128xf32>
    %c3 = arith.constant 3 : index
    %c0_5 = arith.constant 0 : index
    %4 = vector.load %arg5[%c3, %c0_5] : memref<4x128xf32, #tpu.memory_space<vmem>>, vector<1x128xf32>
    %c0_6 = arith.constant 0 : index
    %c0_7 = arith.constant 0 : index
    %5 = vector.load %arg3[%c0_6, %c0_7] : memref<32x128xf32, #tpu.memory_space<vmem>>, vector<32x128xf32>
    %cst = arith.constant dense<0.000000e+00> : vector<16x128xf32>
    %6 = tpu.matmul %0, %5, %cst {dimension_numbers = #tpu.dot_dimension_numbers<[1], [0], [0], [1], [0, 0, 1, 1], [], []>} : vector<16x32xf32>, vector<32x128xf32>, vector<16x128xf32> -> vector<16x128xf32>
    %7 = vector.broadcast %1 : vector<1x128xf32> to vector<16x128xf32>
    %8 = arith.addf %6, %7 : vector<16x128xf32>
    %c0_8 = arith.constant 0 : index
    %c0_9 = arith.constant 0 : index
    %9 = vector.load %arg4[%c0_8, %c0_9] : memref<32x128xf32, #tpu.memory_space<vmem>>, vector<32x128xf32>
    %cst_10 = arith.constant dense<0.000000e+00> : vector<16x128xf32>
    %10 = tpu.matmul %0, %9, %cst_10 {dimension_numbers = #tpu.dot_dimension_numbers<[1], [0], [0], [1], [0, 0, 1, 1], [], []>} : vector<16x32xf32>, vector<32x128xf32>, vector<16x128xf32> -> vector<16x128xf32>
    %11 = vector.broadcast %2 : vector<1x128xf32> to vector<16x128xf32>
    %12 = arith.addf %10, %11 : vector<16x128xf32>
    %cst_11 = arith.constant 5.000000e-01 : f32
    %13 = vector.broadcast %cst_11 : f32 to vector<16x128xf32>
    %14 = arith.mulf %13, %12 : vector<16x128xf32>
    %15 = math.tanh %14 : vector<16x128xf32>
    %cst_12 = arith.constant 5.000000e-01 : f32
    %16 = vector.broadcast %cst_12 : f32 to vector<16x128xf32>
    %17 = arith.mulf %16, %15 : vector<16x128xf32>
    %cst_13 = arith.constant 5.000000e-01 : f32
    %18 = vector.broadcast %cst_13 : f32 to vector<16x128xf32>
    %19 = arith.addf %17, %18 : vector<16x128xf32>
    %20 = arith.mulf %8, %19 : vector<16x128xf32>
    %c0_14 = arith.constant 0 : index
    %c0_15 = arith.constant 0 : index
    %21 = vector.load %arg2[%c0_14, %c0_15] : memref<16x128xf32, #tpu.memory_space<vmem>>, vector<16x128xf32>
    %22 = arith.addf %20, %21 : vector<16x128xf32>
    %cst_16 = arith.constant dense<0.000000e+00> : vector<16xf32>
    %23 = vector.multi_reduction <add>, %22, %cst_16 [1] : vector<16x128xf32> to vector<16xf32>
    %24 = vector.shape_cast %23 : vector<16xf32> to vector<16x1xf32>
    %25 = arith.mulf %22, %22 : vector<16x128xf32>
    %cst_17 = arith.constant dense<0.000000e+00> : vector<16xf32>
    %26 = vector.multi_reduction <add>, %25, %cst_17 [1] : vector<16x128xf32> to vector<16xf32>
    %27 = vector.shape_cast %26 : vector<16xf32> to vector<16x1xf32>
    %cst_18 = arith.constant 3.125000e-02 : f32
    %28 = vector.broadcast %cst_18 : f32 to vector<16x1xf32>
    %29 = arith.mulf %24, %28 : vector<16x1xf32>
    %cst_19 = arith.constant 3.125000e-02 : f32
    %30 = vector.broadcast %cst_19 : f32 to vector<16x1xf32>
    %31 = arith.mulf %27, %30 : vector<16x1xf32>
    %32 = arith.mulf %29, %29 : vector<16x1xf32>
    %33 = arith.subf %31, %32 : vector<16x1xf32>
    %cst_20 = arith.constant 0.000000e+00 : f32
    %34 = vector.broadcast %cst_20 : f32 to vector<16x1xf32>
    %35 = arith.maximumf %33, %34 : vector<16x1xf32>
    %36 = vector.broadcast %29 : vector<16x1xf32> to vector<16x128xf32>
    %37 = arith.subf %22, %36 : vector<16x128xf32>
    %cst_21 = arith.constant 9.99999974E-6 : f32
    %38 = vector.broadcast %cst_21 : f32 to vector<16x1xf32>
    %39 = arith.addf %35, %38 : vector<16x1xf32>
    %40 = math.rsqrt %39 : vector<16x1xf32>
    %41 = vector.broadcast %40 : vector<16x1xf32> to vector<16x128xf32>
    %42 = arith.mulf %37, %41 : vector<16x128xf32>
    %43 = vector.broadcast %3 : vector<1x128xf32> to vector<16x128xf32>
    %44 = arith.mulf %42, %43 : vector<16x128xf32>
    %45 = vector.broadcast %4 : vector<1x128xf32> to vector<16x128xf32>
    %46 = arith.addf %44, %45 : vector<16x128xf32>
    %c0_22 = arith.constant 0 : index
    %c0_23 = arith.constant 0 : index
    %47 = vector.load %arg6[%c0_22, %c0_23] : memref<16x128xf32, #tpu.memory_space<vmem>>, vector<16x128xf32>
    tpu.vector_store %arg6[%c0_22, %c0_23], %46 {strides = array<i32>} : memref<16x128xf32, #tpu.memory_space<vmem>>, vector<16x128xf32>,
    return
  }
  func.func @transform_0(%arg0: i32) -> (i32, i32) {
    %c0_i32 = arith.constant 0 : i32
    %c0_i32_0 = arith.constant 0 : i32
    return %arg0, %c0_i32 : i32, i32
  }
  func.func @transform_1(%arg0: i32) -> (i32, i32) {
    %c0_i32 = arith.constant 0 : i32
    %c0_i32_0 = arith.constant 0 : i32
    return %arg0, %c0_i32 : i32, i32
  }
  func.func @transform_2(%arg0: i32) -> (i32, i32) {
    %c0_i32 = arith.constant 0 : i32
    %c0_i32_0 = arith.constant 0 : i32
    %c0_i32_1 = arith.constant 0 : i32
    return %c0_i32, %c0_i32_0 : i32, i32
  }
  func.func @transform_3(%arg0: i32) -> (i32, i32) {
    %c0_i32 = arith.constant 0 : i32
    %c0_i32_0 = arith.constant 0 : i32
    %c0_i32_1 = arith.constant 0 : i32
    return %c0_i32, %c0_i32_0 : i32, i32
  }
  func.func @transform_4(%arg0: i32) -> (i32, i32) {
    %c0_i32 = arith.constant 0 : i32
    %c0_i32_0 = arith.constant 0 : i32
    %c0_i32_1 = arith.constant 0 : i32
    return %c0_i32, %c0_i32_0 : i32, i32
  }
  func.func @transform_5(%arg0: i32) -> (i32, i32) {
    %c0_i32 = arith.constant 0 : i32
    %c0_i32_0 = arith.constant 0 : i32
    return %arg0, %c0_i32 : i32, i32
  }
}

module attributes {stable_mosaic.version = 11 : i64} {
  func.func @_gate_add_norm_kernel(%arg0: i32, %arg1: memref<16x32xf32, #tpu.memory_space<vmem>>, %arg2: memref<16x128xf32, #tpu.memory_space<vmem>>, %arg3: memref<32x128xf32, #tpu.memory_space<vmem>>, %arg4: memref<32x128xf32, #tpu.memory_space<vmem>>, %arg5: memref<4x128xf32, #tpu.memory_space<vmem>>, %arg6: memref<16x128xf32, #tpu.memory_space<vmem>>) attributes {dimension_semantics = [#tpu.dimension_semantics<parallel>], iteration_bounds = array<i64: 1>, scalar_prefetch = 0 : i64, scratch_operands = 0 : i64, tpu.core_type = #tpu.core_type<tc>, window_params = [{transform_indices = @transform_0, window_bounds = array<i64: 16, 32>}, {transform_indices = @transform_1, window_bounds = array<i64: 16, 128>}, {pipeline_mode = #tpu.pipeline_mode<synchronous>, transform_indices = @transform_2, window_bounds = array<i64: 32, 128>}, {pipeline_mode = #tpu.pipeline_mode<synchronous>, transform_indices = @transform_3, window_bounds = array<i64: 32, 128>}, {pipeline_mode = #tpu.pipeline_mode<synchronous>, transform_indices = @transform_4, window_bounds = array<i64: 4, 128>}, {transform_indices = @transform_5, window_bounds = array<i64: 16, 128>}]} {
    %c0 = arith.constant 0 : index
    %c0_0 = arith.constant 0 : index
    %0 = vector.load %arg1[%c0, %c0_0] : memref<16x32xf32, #tpu.memory_space<vmem>>, vector<16x32xf32>
    %c0_1 = arith.constant 0 : index
    %c0_2 = arith.constant 0 : index
    %1 = vector.load %arg5[%c0_1, %c0_2] : memref<4x128xf32, #tpu.memory_space<vmem>>, vector<1x128xf32>
    %c1 = arith.constant 1 : index
    %c0_3 = arith.constant 0 : index
    %2 = vector.load %arg5[%c1, %c0_3] : memref<4x128xf32, #tpu.memory_space<vmem>>, vector<1x128xf32>
    %c2 = arith.constant 2 : index
    %c0_4 = arith.constant 0 : index
    %3 = vector.load %arg5[%c2, %c0_4] : memref<4x128xf32, #tpu.memory_space<vmem>>, vector<1x128xf32>
    %c3 = arith.constant 3 : index
    %c0_5 = arith.constant 0 : index
    %4 = vector.load %arg5[%c3, %c0_5] : memref<4x128xf32, #tpu.memory_space<vmem>>, vector<1x128xf32>
    %c0_6 = arith.constant 0 : index
    %c0_7 = arith.constant 0 : index
    %5 = vector.load %arg3[%c0_6, %c0_7] : memref<32x128xf32, #tpu.memory_space<vmem>>, vector<32x128xf32>
    %cst = arith.constant dense<0.000000e+00> : vector<16x128xf32>
    %6 = tpu.matmul %0, %5, %cst {dimension_numbers = #tpu.dot_dimension_numbers<[1], [0], [0], [1], [0, 0, 1, 1], [], []>} : vector<16x32xf32>, vector<32x128xf32>, vector<16x128xf32> -> vector<16x128xf32>
    %7 = vector.broadcast %1 : vector<1x128xf32> to vector<16x128xf32>
    %8 = arith.addf %6, %7 : vector<16x128xf32>
    %c0_8 = arith.constant 0 : index
    %c0_9 = arith.constant 0 : index
    %9 = vector.load %arg4[%c0_8, %c0_9] : memref<32x128xf32, #tpu.memory_space<vmem>>, vector<32x128xf32>
    %cst_10 = arith.constant dense<0.000000e+00> : vector<16x128xf32>
    %10 = tpu.matmul %0, %9, %cst_10 {dimension_numbers = #tpu.dot_dimension_numbers<[1], [0], [0], [1], [0, 0, 1, 1], [], []>} : vector<16x32xf32>, vector<32x128xf32>, vector<16x128xf32> -> vector<16x128xf32>
    %11 = vector.broadcast %2 : vector<1x128xf32> to vector<16x128xf32>
    %12 = arith.addf %10, %11 : vector<16x128xf32>
    %cst_11 = arith.constant 5.000000e-01 : f32
    %13 = vector.broadcast %cst_11 : f32 to vector<16x128xf32>
    %14 = arith.mulf %13, %12 : vector<16x128xf32>
    %15 = math.tanh %14 : vector<16x128xf32>
    %cst_12 = arith.constant 5.000000e-01 : f32
    %16 = vector.broadcast %cst_12 : f32 to vector<16x128xf32>
    %17 = arith.mulf %16, %15 : vector<16x128xf32>
    %cst_13 = arith.constant 5.000000e-01 : f32
    %18 = vector.broadcast %cst_13 : f32 to vector<16x128xf32>
    %19 = arith.addf %17, %18 : vector<16x128xf32>
    %20 = arith.mulf %8, %19 : vector<16x128xf32>
    %c0_14 = arith.constant 0 : index
    %c0_15 = arith.constant 0 : index
    %21 = vector.load %arg2[%c0_14, %c0_15] : memref<16x128xf32, #tpu.memory_space<vmem>>, vector<16x128xf32>
    %22 = arith.addf %20, %21 : vector<16x128xf32>
    %cst_16 = arith.constant dense<0.000000e+00> : vector<16xf32>
    %23 = vector.multi_reduction <add>, %22, %cst_16 [1] : vector<16x128xf32> to vector<16xf32>
    %24 = vector.shape_cast %23 : vector<16xf32> to vector<16x1xf32>
    %25 = arith.mulf %22, %22 : vector<16x128xf32>
    %cst_17 = arith.constant dense<0.000000e+00> : vector<16xf32>
    %26 = vector.multi_reduction <add>, %25, %cst_17 [1] : vector<16x128xf32> to vector<16xf32>
    %27 = vector.shape_cast %26 : vector<16xf32> to vector<16x1xf32>
    %cst_18 = arith.constant 3.125000e-02 : f32
    %28 = vector.broadcast %cst_18 : f32 to vector<16x1xf32>
    %29 = arith.mulf %24, %28 : vector<16x1xf32>
    %cst_19 = arith.constant 3.125000e-02 : f32
    %30 = vector.broadcast %cst_19 : f32 to vector<16x1xf32>
    %31 = arith.mulf %27, %30 : vector<16x1xf32>
    %32 = arith.mulf %29, %29 : vector<16x1xf32>
    %33 = arith.subf %31, %32 : vector<16x1xf32>
    %cst_20 = arith.constant 0.000000e+00 : f32
    %34 = vector.broadcast %cst_20 : f32 to vector<16x1xf32>
    %35 = arith.maximumf %33, %34 : vector<16x1xf32>
    %36 = vector.broadcast %29 : vector<16x1xf32> to vector<16x128xf32>
    %37 = arith.subf %22, %36 : vector<16x128xf32>
    %cst_21 = arith.constant 9.99999974E-6 : f32
    %38 = vector.broadcast %cst_21 : f32 to vector<16x1xf32>
    %39 = arith.addf %35, %38 : vector<16x1xf32>
    %40 = math.rsqrt %39 : vector<16x1xf32>
    %41 = vector.broadcast %40 : vector<16x1xf32> to vector<16x128xf32>
    %42 = arith.mulf %37, %41 : vector<16x128xf32>
    %43 = vector.broadcast %3 : vector<1x128xf32> to vector<16x128xf32>
    %44 = arith.mulf %42, %43 : vector<16x128xf32>
    %45 = vector.broadcast %4 : vector<1x128xf32> to vector<16x128xf32>
    %46 = arith.addf %44, %45 : vector<16x128xf32>
    %c0_22 = arith.constant 0 : index
    %c0_23 = arith.constant 0 : index
    %47 = vector.load %arg6[%c0_22, %c0_23] : memref<16x128xf32, #tpu.memory_space<vmem>>, vector<16x128xf32>
    tpu.vector_store %arg6[%c0_22, %c0_23], %46 {strides = array<i32>} : memref<16x128xf32, #tpu.memory_space<vmem>>, vector<16x128xf32>,
    return
  }
  func.func @transform_0(%arg0: i32) -> (i32, i32) {
    %c0_i32 = arith.constant 0 : i32
    %c0_i32_0 = arith.constant 0 : i32
    return %arg0, %c0_i32 : i32, i32
  }
  func.func @transform_1(%arg0: i32) -> (i32, i32) {
    %c0_i32 = arith.constant 0 : i32
    %c0_i32_0 = arith.constant 0 : i32
    return %arg0, %c0_i32 : i32, i32
  }
  func.func @transform_2(%arg0: i32) -> (i32, i32) {
    %c0_i32 = arith.constant 0 : i32
    %c0_i32_0 = arith.constant 0 : i32
    %c0_i32_1 = arith.constant 0 : i32
    return %c0_i32, %c0_i32_0 : i32, i32
  }
  func.func @transform_3(%arg0: i32) -> (i32, i32) {
    %c0_i32 = arith.constant 0 : i32
    %c0_i32_0 = arith.constant 0 : i32
    %c0_i32_1 = arith.constant 0 : i32
    return %c0_i32, %c0_i32_0 : i32, i32
  }
  func.func @transform_4(%arg0: i32) -> (i32, i32) {
    %c0_i32 = arith.constant 0 : i32
    %c0_i32_0 = arith.constant 0 : i32
    %c0_i32_1 = arith.constant 0 : i32
    return %c0_i32, %c0_i32_0 : i32, i32
  }
  func.func @transform_5(%arg0: i32) -> (i32, i32) {
    %c0_i32 = arith.constant 0 : i32
    %c0_i32_0 = arith.constant 0 : i32
    return %arg0, %c0_i32 : i32, i32
  }
}

</mosaic_0001>

<bundles_post_ra>
// kernel: tpu_custom_call.1
= control target key start
LH: loop header
LB: loop body
LE: loop exit
PB: predicated region body
PF: predicated region fallthrough
CT: control target
= control target key end

     0   :  { %10 = vsyncpa [#allocation3], 0  ;;  %s663_s0 = inlined_call_operand.hbm [shape: f32[16,32], index: 0, kind: input, shape index: {}]   ;;  %s664_s1 = inlined_call_operand.hbm [shape: f32[16,128], index: 1, kind: input, shape index: {}]   ;;  %s665_s2 = inlined_call_operand.hbm [shape: f32[32,128], index: 2, kind: input, shape index: {}]   ;;  %s666_s3 = inlined_call_operand.hbm [shape: f32[32,128], index: 3, kind: input, shape index: {}]   ;;  %s667_s4 = inlined_call_operand.vmem [shape: f32[4,128], index: 4, kind: input, shape index: {}]   ;;  %s668_s5 = inlined_call_operand.hbm [shape: f32[16,128], index: 5, kind: output, shape index: {}]  }
   0x1   :  { %11 = vsyncpa [#allocation6], 0 }
   0x2   :  { %12 = vsyncpa [#allocation9], 0 }
   0x3   :  { %13 = vsyncpa [#allocation4], 0  ;;  %s521_s18 = smov [#allocation5]   ;;  %s522_s20 = smov [#allocation2]  }
   0x4   :  { %s31_s19 = sshll.u32 %s521_s18, 4  ;;  %s19_s21 = sshll.u32 %s522_s20, 4  ;;  %s32_s19 = int_to_ptr.vmem [resolvable:$true] %s31_s19  ;;  %s558_s21 = int_to_ptr.vmem [resolvable:$true] %s19_s21 }
   0x5   :  { %s403_s24 = scalar_lea.hbm %s664_s1, 256 }
   0x6   :  { %p404_p0 = scmp.ne.s32.totalorder %s664_s1, %s403_s24  ;;  %p407_p1 = scmp.lt.u32.totalorder %s403_s24, %s664_s1 }
   0x8   :  { %p409_p2 = pnand %p407_p1, %p404_p0 }
   0xa   :  { %412 = shalt.err (!%p409_p2)
}
   0xb   :  { %s413_s29 = scalar_lea.vmem %s32_s19, 256  ;;  %p418_p4 = scmp.lt.s32.totalorder %s32_s19, %s32_s19 }
   0xc   :  { %p414_p3 = scmp.ne.s32.totalorder %s32_s19, %s413_s29  ;;  %p419_p5 = scmp.lt.s32.totalorder %s413_s29, %s413_s29 }
   0xe   :  { %p420_p6 = por %p419_p5, %p418_p4 }
  0x10   :  { %p421_p7 = pnand %p420_p6, %p414_p3 }
  0x12   :  { %424 = shalt.err (!%p421_p7)
}
  0x13   :  { %s523_s30 = smov 128   ;;  %s524_s6 = smov 8  }
  0x14   :  { %37 = dma.hbm_to_vmem [thread:$0]  %s664_s1, 256, %s32_s19, [#allocation6], %s523_s30, %s523_s30, %s524_s6  }
  0x15   :  { %s425_s11 = scalar_lea.hbm %s663_s0, 256 }
  0x16   :  { %p426_p8 = scmp.ne.s32.totalorder %s663_s0, %s425_s11  ;;  %p429_p9 = scmp.lt.u32.totalorder %s425_s11, %s663_s0 }
  0x18   :  { %p431_p10 = pnand %p429_p9, %p426_p8 }
  0x1a   :  { %434 = shalt.err (!%p431_p10)
}
  0x1b   :  { %s435_s16 = scalar_lea.vmem %s558_s21, 256  ;;  %p440_p12 = scmp.lt.s32.totalorder %s558_s21, %s558_s21 }
  0x1c   :  { %p436_p11 = scmp.ne.s32.totalorder %s558_s21, %s435_s16  ;;  %p441_p13 = scmp.lt.s32.totalorder %s435_s16, %s435_s16 }
  0x1e   :  { %p442_p0 = por %p441_p13, %p440_p12 }
  0x20   :  { %p443_p1 = pnand %p442_p0, %p436_p11 }
  0x22   :  { %446 = shalt.err (!%p443_p1)
}
  0x23   :  { %25 = dma.hbm_to_vmem [thread:$0]  %s663_s0, 256, %s558_s21, [#allocation3], %s523_s30, %s523_s30, %s524_s6  }
  0x24   :  { %s525_s18 = smov [#allocation7]   ;;  %s526_s20 = smov [#allocation8]  }
  0x25   :  { %s43_s19 = sshll.u32 %s525_s18, 4  ;;  %s55_s22 = sshll.u32 %s526_s20, 4  ;;  %s44_s19 = int_to_ptr.vmem [resolvable:$true] %s43_s19  ;;  %s595_s22 = int_to_ptr.vmem [resolvable:$true] %s55_s22 }
  0x26   :  { %s447_s25 = scalar_lea.hbm %s665_s2, 512 }
  0x27   :  { %p448_p2 = scmp.ne.s32.totalorder %s665_s2, %s447_s25  ;;  %p451_p3 = scmp.lt.u32.totalorder %s447_s25, %s665_s2 }
  0x29   :  { %p453_p4 = pnand %p451_p3, %p448_p2 }
  0x2b   :  { %456 = shalt.err (!%p453_p4)
}
  0x2c   :  { %s457_s0 = scalar_lea.vmem %s44_s19, 512  ;;  %p462_p6 = scmp.lt.s32.totalorder %s44_s19, %s44_s19 }
  0x2d   :  { %p458_p5 = scmp.ne.s32.totalorder %s44_s19, %s457_s0  ;;  %p463_p7 = scmp.lt.s32.totalorder %s457_s0, %s457_s0 }
  0x2f   :  { %p464_p8 = por %p463_p7, %p462_p6 }
  0x31   :  { %p465_p9 = pnand %p464_p8, %p458_p5 }
  0x33   :  { %468 = shalt.err (!%p465_p9)
}
  0x34   :  { %49 = dma.hbm_to_vmem [thread:$0]  %s665_s2, 512, %s44_s19, [#allocation6], %s523_s30, %s523_s30, %s524_s6  }
  0x35   :  { %s469_s10 = scalar_lea.hbm %s666_s3, 512 }
  0x36   :  { %p470_p10 = scmp.ne.s32.totalorder %s666_s3, %s469_s10  ;;  %p473_p11 = scmp.lt.u32.totalorder %s469_s10, %s666_s3 }
  0x38   :  { %p475_p12 = pnand %p473_p11, %p470_p10 }
  0x3a   :  { %478 = shalt.err (!%p475_p12)
}
  0x3b   :  { %s479_s15 = scalar_lea.vmem %s595_s22, 512  ;;  %p484_p0 = scmp.lt.s32.totalorder %s595_s22, %s595_s22 }
  0x3c   :  { %p480_p13 = scmp.ne.s32.totalorder %s595_s22, %s479_s15  ;;  %p485_p1 = scmp.lt.s32.totalorder %s479_s15, %s479_s15 }
  0x3e   :  { %p486_p2 = por %p485_p1, %p484_p0 }
  0x40   :  { %p487_p3 = pnand %p486_p2, %p480_p13 }
  0x42   :  { %490 = shalt.err (!%p487_p3)
}
  0x43   :  { %61 = dma.hbm_to_vmem [thread:$0]  %s666_s3, 512, %s595_s22, [#allocation9], %s523_s30, %s523_s30, %s524_s6  }
  0x44   :  { %513 = dma.done.wait [#allocation3], 256  }
  0x45   :  { %514 = vsyncadd [#allocation3], 4294967040 }
  0x46   :  { %515 = dma.done.wait [#allocation6], 768  }
  0x47   :  { %516 = vsyncadd [#allocation6], 4294966528 }
  0x48   :  { %517 = dma.done.wait [#allocation9], 512  }
  0x49   :  { %518 = vsyncadd [#allocation9], 4294966784  ;;  %vm90_vm0 = vcmask 261120   ;;  %v172_v0 = vld [vmem:[#allocation8] sm:$0xff]  ;;  %v173_v1 = vld [vmem:[#allocation8 + $0x8] sm:$0xff]  ;;  %s527_s24 = smov [#allocation10]  }
  0x4a   :  { %v174_v2 = vld [vmem:[#allocation8 + $0x10] sm:$0xff]  ;;  %v380_v3 = vpack.c.bf16 %v173_v1, %v172_v0  ;;  %v175_v4 = vld [vmem:[#allocation8 + $0x18] sm:$0xff]  ;;  %v76_v5 = vld [vmem:[#allocation2] sm:$0xff]  ;;  %s316_s25 = sshll.u32 %s527_s24, 4  ;;  %s317_s25 = int_to_ptr.vmem [resolvable:$true] %s316_s25 }
  0x4b   :  { %v384_v6 = vpack.c.bf16 %v175_v4, %v174_v2  ;;  %369 = vmatprep.mubr.msk.f32.mxu1 %vm90_vm0, %v76_v5  ;;  %v82_v7 = vld [vmem:[#allocation7] sm:$0xff]  ;;  %v83_v8 = vld [vmem:[#allocation7 + $0x8] sm:$0xff]  ;;  %v84_v9 = vld [vmem:[#allocation7 + $0x10] sm:$0xff]  ;;  %358 = vmatprep.mubr.msk.f32.mxu0 %vm90_vm0, %v76_v5  ;;  %s491_s26 = scalar_lea.vmem %s317_s25, 256  ;;  %p496_p5 = scmp.lt.s32.totalorder %s317_s25, %s317_s25 }
  0x4c   :  { %381 = vmatprep.subr.bf16.mxu1 %v380_v3  ;;  %v372_v10 = vpack.c.bf16 %v83_v8, %v82_v7  ;;  %v85_v11 = vld [vmem:[#allocation7 + $0x18] sm:$0xff]  ;;  %v77_v13 = vld [vmem:[#allocation2 + $0x8] sm:$0xff]  ;;  %v333_v14 = vld [vmem:[%s667_s4 + $0x1] ss:$0 sm:$0xff]  ;;  %p492_p4 = scmp.ne.s32.totalorder %s317_s25, %s491_s26  ;;  %p497_p6 = scmp.lt.s32.totalorder %s491_s26, %s491_s26 }
  0x4d   :  { %383 = vmatpush3.bf16.msra.mxu1 %v380_v3  ;;  %v376_v12 = vpack.c.bf16 %v85_v11, %v84_v9  ;;  %v330_v23 = vld [vmem:[%s667_s4] ss:$0 sm:$0xff]  ;;  %v265_v33 = vld [vmem:[#allocation5] sm:$0xff]  ;;  %v266_v35 = vld [vmem:[#allocation5 + $0x8] sm:$0xff] }
  0x4e   :  { %385 = vmatprep.subr.bf16.mxu1 %v384_v6  ;;  %373 = vmatprep.subr.bf16.mxu0 %v372_v10  ;;  %v336_v58 = vld [vmem:[%s667_s4 + $0x2] ss:$0 sm:$0xff]  ;;  %v337_v60 = vld [vmem:[%s667_s4 + $0x3] ss:$0 sm:$0xff]  ;;  %p498_p7 = por %p497_p6, %p496_p5 }
  0x4f   :  { %375 = vmatpush3.bf16.msra.mxu0 %v372_v10 }
  0x50   :  { %377 = vmatprep.subr.bf16.mxu0 %v376_v12  ;;  %p499_p8 = pnand %p498_p7, %p492_p4 }
  0x51   :  { %387 = vmatpush3.bf16.msra.mxu1 %v384_v6 }
  0x53   :  { %379 = vmatpush3.bf16.msra.mxu0 %v376_v12 }
  0x54   :  { %370 = vmatmul.mubr.msk.f32.vlgmr.msra.gmra.mrb[0].mxu1 %vm90_vm0, %v77_v13 }
  0x56   :  { %359 = vmatmul.mubr.msk.f32.vlgmr.msra.gmra.mrb[0].mxu0 %vm90_vm0, %v77_v13 }
 0x127   :  { %v371_v15 = vpop.f32.mrb[0].mxu1 }
 0x128   :  { %v252_v16 = vadd.f32 %v371_v15, %v333_v14  ;;  %v246_v17 = vpop.f32.mrb[1].mxu1 }
 0x129   :  { %v247_v18 = vadd.f32 %v333_v14, %v246_v17  ;;  %v360_v19 = vpop.f32.mrb[0].mxu0 }
 0x12a   :  { %v256_v20 = vmul.f32 0.5, %v252_v16  ;;  %v163_v21 = vpop.f32.mrb[1].mxu0  ;;  %v169_v27 = vadd.f32 %v360_v19, %v330_v23 }
 0x12b   :  { %v255_v22 = vmul.f32 0.5, %v247_v18  ;;  %v164_v29 = vadd.f32 %v330_v23, %v163_v21 }
 0x12c   :  { %395 = vtanh.f32 %v256_v20 }
 0x12d   :  { %397 = vtanh.f32 %v255_v22 }
 0x136   :  { %v396_v24 = vpop.eup %395 }
 0x137   :  { %v398_v25 = vpop.eup %397  ;;  %v260_v26 = vmul.f32 0.5, %v396_v24 }
 0x138   :  { %v259_v28 = vmul.f32 0.5, %v398_v25 }
 0x139   :  { %v262_v30 = vadd.f32 0.5, %v260_v26 }
 0x13a   :  { %v261_v31 = vadd.f32 0.5, %v259_v28 }
 0x13b   :  { %v264_v32 = vmul.f32 %v262_v30, %v169_v27 }
 0x13c   :  { %v263_v34 = vmul.f32 %v261_v31, %v164_v29 }
 0x13d   :  { %v268_v38 = vadd.f32 %v266_v35, %v264_v32 }
 0x13e   :  { %v267_v36 = vadd.f32 %v265_v33, %v263_v34 }
 0x13f   :  { %v274_v39 = vmul.f32 %v268_v38, %v268_v38 }
 0x140   :  { %269 = vadd.xlane.f32.xlu0 %v267_v36  ;;  %v273_v37 = vmul.f32 %v267_v36, %v267_v36 }
 0x142   :  { %275 = vadd.xlane.f32.xlu1 %v273_v37 }
 0x144   :  { %271 = vadd.xlane.f32.xlu0 %v268_v38 }
 0x146   :  { %277 = vadd.xlane.f32.xlu1 %v274_v39 }
 0x1cd   :  { %v270_v40 = vpop.xlane.xlu0 %269 }
 0x1ce   :  { %v279_v41 = vmul.f32 0.03125, %v270_v40 }
 0x1cf   :  { %v276_v42 = vpop.xlane.xlu1 %275 }
 0x1d0   :  { %v283_v43 = vmul.f32 %v279_v41, %v279_v41  ;;  %v281_v44 = vmul.f32 0.03125, %v276_v42  ;;  %v289_v56 = vsub.f32 %v267_v36, %v279_v41 }
 0x1d1   :  { %v272_v45 = vpop.xlane.xlu0 %271 }
 0x1d2   :  { %v285_v46 = vsub.f32 %v281_v44, %v283_v43  ;;  %v280_v47 = vmul.f32 0.03125, %v272_v45 }
 0x1d3   :  { %v278_v48 = vpop.xlane.xlu1 %277 }
 0x1d4   :  { %v287_v49 = vmax.f32 %v285_v46, 0.0  ;;  %v284_v50 = vmul.f32 %v280_v47, %v280_v47  ;;  %v282_v51 = vmul.f32 0.03125, %v278_v48  ;;  %v290_v61 = vsub.f32 %v268_v38, %v280_v47 }
 0x1d6   :  { %v291_v52 = vadd.f32 1e-05, %v287_v49  ;;  %v286_v53 = vsub.f32 %v282_v51, %v284_v50 }
 0x1d8   :  { %399 = vrsqrt.f32 %v291_v52  ;;  %v288_v54 = vmax.f32 %v286_v53, 0.0 }
 0x1da   :  { %v292_v55 = vadd.f32 1e-05, %v288_v54 }
 0x1dc   :  { %401 = vrsqrt.f32 %v292_v55 }
 0x1e2   :  { %v400_v57 = vpop.eup %399 }
 0x1e3   :  { %v295_v59 = vmul.f32 %v400_v57, %v289_v56 }
 0x1e5   :  { %v301_v62 = vmul.f32 %v336_v58, %v295_v59 }
 0x1e6   :  { %v402_v63 = vpop.eup %401 }
 0x1e7   :  { %v296_v0 = vmul.f32 %v402_v63, %v290_v61  ;;  %v307_v1 = vadd.f32 %v337_v60, %v301_v62 }
 0x1e9   :  { %v302_v2 = vmul.f32 %v336_v58, %v296_v0  ;;  %309 = vst [vmem:[#allocation10] sm:$0xff] %v307_v1 }
 0x1eb   :  { %v308_v3 = vadd.f32 %v337_v60, %v302_v2 }
 0x1ed   :  { %310 = vst [vmem:[#allocation10 + $0x8] sm:$0xff] %v308_v3 }
 0x1ee   :  { %502 = shalt.err (!%p499_p8)
}
 0x1ef   :  { %s503_s28 = scalar_lea.hbm %s668_s5, 256 }
 0x1f0   :  { %p504_p9 = scmp.ne.s32.totalorder %s668_s5, %s503_s28  ;;  %p507_p10 = scmp.lt.u32.totalorder %s503_s28, %s668_s5 }
 0x1f2   :  { %p509_p11 = pnand %p507_p10, %p504_p9 }
 0x1f4   :  { %512 = shalt.err (!%p509_p11)
}
 0x1f5   :  { %322 = dma.vmem_to_hbm [thread:$0]  %s317_s25, 256, %s668_s5, [#allocation4], %s523_s30, %s523_s30, %s524_s6  }
 0x1f6   :  { %519 = dma.done.wait [#allocation4], 256  }
 0x1f7   :  { %520 = vsyncadd [#allocation4], 4294967040 }
 0x1f8   :  { %326 = vsyncpa [#allocation3], 1 }
 0x1f9   :  { %327 = vsyncpa [#allocation6], 1 }
 0x1fa   :  { %328 = vsyncpa [#allocation9], 1 }
 0x1fb   :  { %329 = vsyncpa [#allocation4], 1 }

// kernel: tpu_custom_call.1
= control target key start
LH: loop header
LB: loop body
LE: loop exit
PB: predicated region body
PF: predicated region fallthrough
CT: control target
= control target key end

     0   :  { %10 = vsyncpa [#allocation3], 0  ;;  %s663_s0 = inlined_call_operand.hbm [shape: f32[16,32], index: 0, kind: input, shape index: {}]   ;;  %s664_s1 = inlined_call_operand.hbm [shape: f32[16,128], index: 1, kind: input, shape index: {}]   ;;  %s665_s2 = inlined_call_operand.hbm [shape: f32[32,128], index: 2, kind: input, shape index: {}]   ;;  %s666_s3 = inlined_call_operand.hbm [shape: f32[32,128], index: 3, kind: input, shape index: {}]   ;;  %s667_s4 = inlined_call_operand.vmem [shape: f32[4,128], index: 4, kind: input, shape index: {}]   ;;  %s668_s5 = inlined_call_operand.hbm [shape: f32[16,128], index: 5, kind: output, shape index: {}]  }
   0x1   :  { %11 = vsyncpa [#allocation6], 0 }
   0x2   :  { %12 = vsyncpa [#allocation9], 0 }
   0x3   :  { %13 = vsyncpa [#allocation4], 0  ;;  %s521_s18 = smov [#allocation5]   ;;  %s522_s20 = smov [#allocation2]  }
   0x4   :  { %s31_s19 = sshll.u32 %s521_s18, 4  ;;  %s19_s21 = sshll.u32 %s522_s20, 4  ;;  %s32_s19 = int_to_ptr.vmem [resolvable:$true] %s31_s19  ;;  %s558_s21 = int_to_ptr.vmem [resolvable:$true] %s19_s21 }
   0x5   :  { %s403_s24 = scalar_lea.hbm %s664_s1, 256 }
   0x6   :  { %p404_p0 = scmp.ne.s32.totalorder %s664_s1, %s403_s24  ;;  %p407_p1 = scmp.lt.u32.totalorder %s403_s24, %s664_s1 }
   0x8   :  { %p409_p2 = pnand %p407_p1, %p404_p0 }
   0xa   :  { %412 = shalt.err (!%p409_p2)
}
   0xb   :  { %s413_s29 = scalar_lea.vmem %s32_s19, 256  ;;  %p418_p4 = scmp.lt.s32.totalorder %s32_s19, %s32_s19 }
   0xc   :  { %p414_p3 = scmp.ne.s32.totalorder %s32_s19, %s413_s29  ;;  %p419_p5 = scmp.lt.s32.totalorder %s413_s29, %s413_s29 }
   0xe   :  { %p420_p6 = por %p419_p5, %p418_p4 }
  0x10   :  { %p421_p7 = pnand %p420_p6, %p414_p3 }
  0x12   :  { %424 = shalt.err (!%p421_p7)
}
  0x13   :  { %s523_s30 = smov 128   ;;  %s524_s6 = smov 8  }
  0x14   :  { %37 = dma.hbm_to_vmem [thread:$0]  %s664_s1, 256, %s32_s19, [#allocation6], %s523_s30, %s523_s30, %s524_s6  }
  0x15   :  { %s425_s11 = scalar_lea.hbm %s663_s0, 256 }
  0x16   :  { %p426_p8 = scmp.ne.s32.totalorder %s663_s0, %s425_s11  ;;  %p429_p9 = scmp.lt.u32.totalorder %s425_s11, %s663_s0 }
  0x18   :  { %p431_p10 = pnand %p429_p9, %p426_p8 }
  0x1a   :  { %434 = shalt.err (!%p431_p10)
}
  0x1b   :  { %s435_s16 = scalar_lea.vmem %s558_s21, 256  ;;  %p440_p12 = scmp.lt.s32.totalorder %s558_s21, %s558_s21 }
  0x1c   :  { %p436_p11 = scmp.ne.s32.totalorder %s558_s21, %s435_s16  ;;  %p441_p13 = scmp.lt.s32.totalorder %s435_s16, %s435_s16 }
  0x1e   :  { %p442_p0 = por %p441_p13, %p440_p12 }
  0x20   :  { %p443_p1 = pnand %p442_p0, %p436_p11 }
  0x22   :  { %446 = shalt.err (!%p443_p1)
}
  0x23   :  { %25 = dma.hbm_to_vmem [thread:$0]  %s663_s0, 256, %s558_s21, [#allocation3], %s523_s30, %s523_s30, %s524_s6  }
  0x24   :  { %s525_s18 = smov [#allocation7]   ;;  %s526_s20 = smov [#allocation8]  }
  0x25   :  { %s43_s19 = sshll.u32 %s525_s18, 4  ;;  %s55_s22 = sshll.u32 %s526_s20, 4  ;;  %s44_s19 = int_to_ptr.vmem [resolvable:$true] %s43_s19  ;;  %s595_s22 = int_to_ptr.vmem [resolvable:$true] %s55_s22 }
  0x26   :  { %s447_s25 = scalar_lea.hbm %s665_s2, 512 }
  0x27   :  { %p448_p2 = scmp.ne.s32.totalorder %s665_s2, %s447_s25  ;;  %p451_p3 = scmp.lt.u32.totalorder %s447_s25, %s665_s2 }
  0x29   :  { %p453_p4 = pnand %p451_p3, %p448_p2 }
  0x2b   :  { %456 = shalt.err (!%p453_p4)
}
  0x2c   :  { %s457_s0 = scalar_lea.vmem %s44_s19, 512  ;;  %p462_p6 = scmp.lt.s32.totalorder %s44_s19, %s44_s19 }
  0x2d   :  { %p458_p5 = scmp.ne.s32.totalorder %s44_s19, %s457_s0  ;;  %p463_p7 = scmp.lt.s32.totalorder %s457_s0, %s457_s0 }
  0x2f   :  { %p464_p8 = por %p463_p7, %p462_p6 }
  0x31   :  { %p465_p9 = pnand %p464_p8, %p458_p5 }
  0x33   :  { %468 = shalt.err (!%p465_p9)
}
  0x34   :  { %49 = dma.hbm_to_vmem [thread:$0]  %s665_s2, 512, %s44_s19, [#allocation6], %s523_s30, %s523_s30, %s524_s6  }
  0x35   :  { %s469_s10 = scalar_lea.hbm %s666_s3, 512 }
  0x36   :  { %p470_p10 = scmp.ne.s32.totalorder %s666_s3, %s469_s10  ;;  %p473_p11 = scmp.lt.u32.totalorder %s469_s10, %s666_s3 }
  0x38   :  { %p475_p12 = pnand %p473_p11, %p470_p10 }
  0x3a   :  { %478 = shalt.err (!%p475_p12)
}
  0x3b   :  { %s479_s15 = scalar_lea.vmem %s595_s22, 512  ;;  %p484_p0 = scmp.lt.s32.totalorder %s595_s22, %s595_s22 }
  0x3c   :  { %p480_p13 = scmp.ne.s32.totalorder %s595_s22, %s479_s15  ;;  %p485_p1 = scmp.lt.s32.totalorder %s479_s15, %s479_s15 }
  0x3e   :  { %p486_p2 = por %p485_p1, %p484_p0 }
  0x40   :  { %p487_p3 = pnand %p486_p2, %p480_p13 }
  0x42   :  { %490 = shalt.err (!%p487_p3)
}
  0x43   :  { %61 = dma.hbm_to_vmem [thread:$0]  %s666_s3, 512, %s595_s22, [#allocation9], %s523_s30, %s523_s30, %s524_s6  }
  0x44   :  { %513 = dma.done.wait [#allocation3], 256  }
  0x45   :  { %514 = vsyncadd [#allocation3], 4294967040 }
  0x46   :  { %515 = dma.done.wait [#allocation6], 768  }
  0x47   :  { %516 = vsyncadd [#allocation6], 4294966528 }
  0x48   :  { %517 = dma.done.wait [#allocation9], 512  }
  0x49   :  { %518 = vsyncadd [#allocation9], 4294966784  ;;  %vm90_vm0 = vcmask 261120   ;;  %v172_v0 = vld [vmem:[#allocation8] sm:$0xff]  ;;  %v173_v1 = vld [vmem:[#allocation8 + $0x8] sm:$0xff]  ;;  %s527_s24 = smov [#allocation10]  }
  0x4a   :  { %v174_v2 = vld [vmem:[#allocation8 + $0x10] sm:$0xff]  ;;  %v380_v3 = vpack.c.bf16 %v173_v1, %v172_v0  ;;  %v175_v4 = vld [vmem:[#allocation8 + $0x18] sm:$0xff]  ;;  %v76_v5 = vld [vmem:[#allocation2] sm:$0xff]  ;;  %s316_s25 = sshll.u32 %s527_s24, 4  ;;  %s317_s25 = int_to_ptr.vmem [resolvable:$true] %s316_s25 }
  0x4b   :  { %v384_v6 = vpack.c.bf16 %v175_v4, %v174_v2  ;;  %369 = vmatprep.mubr.msk.f32.mxu1 %vm90_vm0, %v76_v5  ;;  %v82_v7 = vld [vmem:[#allocation7] sm:$0xff]  ;;  %v83_v8 = vld [vmem:[#allocation7 + $0x8] sm:$0xff]  ;;  %v84_v9 = vld [vmem:[#allocation7 + $0x10] sm:$0xff]  ;;  %358 = vmatprep.mubr.msk.f32.mxu0 %vm90_vm0, %v76_v5  ;;  %s491_s26 = scalar_lea.vmem %s317_s25, 256  ;;  %p496_p5 = scmp.lt.s32.totalorder %s317_s25, %s317_s25 }
  0x4c   :  { %381 = vmatprep.subr.bf16.mxu1 %v380_v3  ;;  %v372_v10 = vpack.c.bf16 %v83_v8, %v82_v7  ;;  %v85_v11 = vld [vmem:[#allocation7 + $0x18] sm:$0xff]  ;;  %v77_v13 = vld [vmem:[#allocation2 + $0x8] sm:$0xff]  ;;  %v333_v14 = vld [vmem:[%s667_s4 + $0x1] ss:$0 sm:$0xff]  ;;  %p492_p4 = scmp.ne.s32.totalorder %s317_s25, %s491_s26  ;;  %p497_p6 = scmp.lt.s32.totalorder %s491_s26, %s491_s26 }
  0x4d   :  { %383 = vmatpush3.bf16.msra.mxu1 %v380_v3  ;;  %v376_v12 = vpack.c.bf16 %v85_v11, %v84_v9  ;;  %v330_v23 = vld [vmem:[%s667_s4] ss:$0 sm:$0xff]  ;;  %v265_v33 = vld [vmem:[#allocation5] sm:$0xff]  ;;  %v266_v35 = vld [vmem:[#allocation5 + $0x8] sm:$0xff] }
  0x4e   :  { %385 = vmatprep.subr.bf16.mxu1 %v384_v6  ;;  %373 = vmatprep.subr.bf16.mxu0 %v372_v10  ;;  %v336_v58 = vld [vmem:[%s667_s4 + $0x2] ss:$0 sm:$0xff]  ;;  %v337_v60 = vld [vmem:[%s667_s4 + $0x3] ss:$0 sm:$0xff]  ;;  %p498_p7 = por %p497_p6, %p496_p5 }
  0x4f   :  { %375 = vmatpush3.bf16.msra.mxu0 %v372_v10 }
  0x50   :  { %377 = vmatprep.subr.bf16.mxu0 %v376_v12  ;;  %p499_p8 = pnand %p498_p7, %p492_p4 }
  0x51   :  { %387 = vmatpush3.bf16.msra.mxu1 %v384_v6 }
  0x53   :  { %379 = vmatpush3.bf16.msra.mxu0 %v376_v12 }
  0x54   :  { %370 = vmatmul.mubr.msk.f32.vlgmr.msra.gmra.mrb[0].mxu1 %vm90_vm0, %v77_v13 }
  0x56   :  { %359 = vmatmul.mubr.msk.f32.vlgmr.msra.gmra.mrb[0].mxu0 %vm90_vm0, %v77_v13 }
 0x127   :  { %v371_v15 = vpop.f32.mrb[0].mxu1 }
 0x128   :  { %v252_v16 = vadd.f32 %v371_v15, %v333_v14  ;;  %v246_v17 = vpop.f32.mrb[1].mxu1 }
 0x129   :  { %v247_v18 = vadd.f32 %v333_v14, %v246_v17  ;;  %v360_v19 = vpop.f32.mrb[0].mxu0 }
 0x12a   :  { %v256_v20 = vmul.f32 0.5, %v252_v16  ;;  %v163_v21 = vpop.f32.mrb[1].mxu0  ;;  %v169_v27 = vadd.f32 %v360_v19, %v330_v23 }
 0x12b   :  { %v255_v22 = vmul.f32 0.5, %v247_v18  ;;  %v164_v29 = vadd.f32 %v330_v23, %v163_v21 }
 0x12c   :  { %395 = vtanh.f32 %v256_v20 }
 0x12d   :  { %397 = vtanh.f32 %v255_v22 }
 0x136   :  { %v396_v24 = vpop.eup %395 }
 0x137   :  { %v398_v25 = vpop.eup %397  ;;  %v260_v26 = vmul.f32 0.5, %v396_v24 }
 0x138   :  { %v259_v28 = vmul.f32 0.5, %v398_v25 }
 0x139   :  { %v262_v30 = vadd.f32 0.5, %v260_v26 }
 0x13a   :  { %v261_v31 = vadd.f32 0.5, %v259_v28 }
 0x13b   :  { %v264_v32 = vmul.f32 %v262_v30, %v169_v27 }
 0x13c   :  { %v263_v34 = vmul.f32 %v261_v31, %v164_v29 }
 0x13d   :  { %v268_v38 = vadd.f32 %v266_v35, %v264_v32 }
 0x13e   :  { %v267_v36 = vadd.f32 %v265_v33, %v263_v34 }
 0x13f   :  { %v274_v39 = vmul.f32 %v268_v38, %v268_v38 }
 0x140   :  { %269 = vadd.xlane.f32.xlu0 %v267_v36  ;;  %v273_v37 = vmul.f32 %v267_v36, %v267_v36 }
 0x142   :  { %275 = vadd.xlane.f32.xlu1 %v273_v37 }
 0x144   :  { %271 = vadd.xlane.f32.xlu0 %v268_v38 }
 0x146   :  { %277 = vadd.xlane.f32.xlu1 %v274_v39 }
 0x1cd   :  { %v270_v40 = vpop.xlane.xlu0 %269 }
 0x1ce   :  { %v279_v41 = vmul.f32 0.03125, %v270_v40 }
 0x1cf   :  { %v276_v42 = vpop.xlane.xlu1 %275 }
 0x1d0   :  { %v283_v43 = vmul.f32 %v279_v41, %v279_v41  ;;  %v281_v44 = vmul.f32 0.03125, %v276_v42  ;;  %v289_v56 = vsub.f32 %v267_v36, %v279_v41 }
 0x1d1   :  { %v272_v45 = vpop.xlane.xlu0 %271 }
 0x1d2   :  { %v285_v46 = vsub.f32 %v281_v44, %v283_v43  ;;  %v280_v47 = vmul.f32 0.03125, %v272_v45 }
 0x1d3   :  { %v278_v48 = vpop.xlane.xlu1 %277 }
 0x1d4   :  { %v287_v49 = vmax.f32 %v285_v46, 0.0  ;;  %v284_v50 = vmul.f32 %v280_v47, %v280_v47  ;;  %v282_v51 = vmul.f32 0.03125, %v278_v48  ;;  %v290_v61 = vsub.f32 %v268_v38, %v280_v47 }
 0x1d6   :  { %v291_v52 = vadd.f32 1e-05, %v287_v49  ;;  %v286_v53 = vsub.f32 %v282_v51, %v284_v50 }
 0x1d8   :  { %399 = vrsqrt.f32 %v291_v52  ;;  %v288_v54 = vmax.f32 %v286_v53, 0.0 }
 0x1da   :  { %v292_v55 = vadd.f32 1e-05, %v288_v54 }
 0x1dc   :  { %401 = vrsqrt.f32 %v292_v55 }
 0x1e2   :  { %v400_v57 = vpop.eup %399 }
 0x1e3   :  { %v295_v59 = vmul.f32 %v400_v57, %v289_v56 }
 0x1e5   :  { %v301_v62 = vmul.f32 %v336_v58, %v295_v59 }
 0x1e6   :  { %v402_v63 = vpop.eup %401 }
 0x1e7   :  { %v296_v0 = vmul.f32 %v402_v63, %v290_v61  ;;  %v307_v1 = vadd.f32 %v337_v60, %v301_v62 }
 0x1e9   :  { %v302_v2 = vmul.f32 %v336_v58, %v296_v0  ;;  %309 = vst [vmem:[#allocation10] sm:$0xff] %v307_v1 }
 0x1eb   :  { %v308_v3 = vadd.f32 %v337_v60, %v302_v2 }
 0x1ed   :  { %310 = vst [vmem:[#allocation10 + $0x8] sm:$0xff] %v308_v3 }
 0x1ee   :  { %502 = shalt.err (!%p499_p8)
}
 0x1ef   :  { %s503_s28 = scalar_lea.hbm %s668_s5, 256 }
 0x1f0   :  { %p504_p9 = scmp.ne.s32.totalorder %s668_s5, %s503_s28  ;;  %p507_p10 = scmp.lt.u32.totalorder %s503_s28, %s668_s5 }
 0x1f2   :  { %p509_p11 = pnand %p507_p10, %p504_p9 }
 0x1f4   :  { %512 = shalt.err (!%p509_p11)
}
 0x1f5   :  { %322 = dma.vmem_to_hbm [thread:$0]  %s317_s25, 256, %s668_s5, [#allocation4], %s523_s30, %s523_s30, %s524_s6  }
 0x1f6   :  { %519 = dma.done.wait [#allocation4], 256  }
 0x1f7   :  { %520 = vsyncadd [#allocation4], 4294967040 }
 0x1f8   :  { %326 = vsyncpa [#allocation3], 1 }
 0x1f9   :  { %327 = vsyncpa [#allocation6], 1 }
 0x1fa   :  { %328 = vsyncpa [#allocation9], 1 }
 0x1fb   :  { %329 = vsyncpa [#allocation4], 1 }

</bundles_post_ra>
